<compile_context>
chip_gen: v6e
topology: v6e:2x2x1
jax: 0.10.0
libtpu: 0.0.40
codegen_flags: <defaults>
</compile_context>

<pallas_src>
import jax
import jax.numpy as jnp
from jax.experimental import pallas as pl
from jax.experimental.pallas import tpu as pltpu


def _num_dma_chunks(nbytes, leading_dim):
    """How many concurrent DMA descriptors to use for the copy."""
    if leading_dim is None or leading_dim <= 1:
        return 1
    if nbytes >= 64 * 1024 * 1024:      # v7x: need several in-flight DMAs for 3.2 TB/s
        k = 8
    elif nbytes >= 8 * 1024 * 1024:     # v6e: 2-4 descriptors reach ~1.4 TB/s
        k = 4
    elif nbytes >= 1 * 1024 * 1024:
        k = 2
    else:                               # small: descriptor-issue overhead would dominate
        k = 1
    return min(k, leading_dim)


def _chunk_bounds(rows, k):
    """Split `rows` into k contiguous (start, size) ranges (static Python ints)."""
    base, rem = divmod(rows, k)
    bounds, start = [], 0
    for i in range(k):
        size = base + (1 if i < rem else 0)
        bounds.append((start, size))
        start += size
    return bounds


def _make_copy_kernel(chunk_bounds):
    """Kernel factory: issue all chunk DMAs back-to-back, then wait on all."""

    def kernel(src_hbm_ref, dst_hbm_ref, copy_sems):
        copies = []
        for i, bounds in enumerate(chunk_bounds):
            if bounds is None:                       # rank-0 parameter: full-ref copy
                src, dst = src_hbm_ref, dst_hbm_ref
            else:
                start, size = bounds                 # static slice on the leading axis
                src = src_hbm_ref.at[pl.ds(start, size)]
                dst = dst_hbm_ref.at[pl.ds(start, size)]
            cp = pltpu.make_async_copy(src, dst, copy_sems.at[i])
            cp.start()                               # all descriptors in flight...
            copies.append(cp)
        for cp in copies:                            # ...then wait on all of them
            cp.wait()

    return kernel


def _materialize_base(base_param):
    """Produce a distinct buffer holding base() via direct HBM->HBM DMA(s)."""
    if base_param.size == 0:
        # Guard: nothing to copy; avoids lowering a zero-size DMA.
        return base_param

    nbytes = base_param.size * base_param.dtype.itemsize
    leading = base_param.shape[0] if base_param.ndim >= 1 else None
    k = _num_dma_chunks(nbytes, leading)
    if base_param.ndim >= 1:
        chunk_bounds = _chunk_bounds(base_param.shape[0], k)
    else:
        chunk_bounds = [None]

    return pl.pallas_call(
        _make_copy_kernel(chunk_bounds),
        out_shape=jax.ShapeDtypeStruct(base_param.shape, base_param.dtype),
        in_specs=[pl.BlockSpec(memory_space=pl.ANY)],       # raw HBM ref, no auto-DMA
        out_specs=pl.BlockSpec(memory_space=pltpu.HBM),     # pin output: no VMEM staging
        scratch_shapes=[pltpu.SemaphoreType.DMA((len(chunk_bounds),))],
        cost_estimate=pl.CostEstimate(
            flops=0, transcendentals=0, bytes_accessed=2 * nbytes),
    )(base_param)


def context_free_forward(x, base_param, *, materialize_copy=False):
    """Reproduces ContextFreeBase.forward: ignores `x`, returns base().

    Default path moves zero bytes (returns the immutable stored parameter).
    Set materialize_copy=True only if a physically distinct output buffer is
    contractually required; that path runs the Pallas HBM->HBM DMA kernel.
    """
    del x  # the module's forward discards its argument
    if not materialize_copy:
        return base_param
    return _materialize_base(base_param)


if __name__ == "__main__":
    key = jax.random.PRNGKey(0)
    k_base, k_x = jax.random.split(key)

    # Deterministic "base" parameter the no-arg callable would emit.
    base_param = jax.random.normal(k_base, (2, 4, 16, 16), dtype=jnp.float32)

    # Example input -- shape is irrelevant since forward ignores it.
    x = jax.random.normal(k_x, (2, 4, 16, 16), dtype=jnp.float32)

    # Default forward: true roofline (0 bytes moved), just the stored tensor.
    out_fast = jax.block_until_ready(context_free_forward(x, base_param))
    assert out_fast.shape == base_param.shape
    assert jnp.array_equal(out_fast, base_param)

    # Distinct-buffer path: exercise the Pallas HBM->HBM DMA kernel once.
    out_copy = jax.block_until_ready(
        context_free_forward(x, base_param, materialize_copy=True))
    assert out_copy.shape == base_param.shape
    assert jnp.array_equal(out_copy, base_param)

    print("KERNEL_OK")
</pallas_src>

<mosaic_0001>
module attributes {stable_mosaic.version = 11 : i64} {
  func.func @kernel(%arg0: memref<2x4x16x16xf32, #tpu.memory_space<any>>, %arg1: memref<2x4x16x16xf32, #tpu.memory_space<hbm>>, %arg2: memref<1x!tpu.dma_semaphore, #tpu.memory_space<semaphore_mem>>) attributes {dimension_semantics = [], scalar_prefetch = 0 : i64, scratch_operands = 1 : i64, tpu.core_type = #tpu.core_type<tc>} {
    %c0_i32 = arith.constant 0 : i32
    %c0_i32_0 = arith.constant 0 : i32
    %c0_i32_1 = arith.constant 0 : i32
    %c0_i32_2 = arith.constant 0 : i32
    %c0_i32_3 = arith.constant 0 : i32
    %0 = tpu.memref_slice %arg0[%c0_i32_0, %c0_i32_1, %c0_i32_2, %c0_i32_3] : memref<2x4x16x16xf32, #tpu.memory_space<any>> -> memref<2x4x16x16xf32, #tpu.memory_space<any>>
    %c0_i32_4 = arith.constant 0 : i32
    %c0_i32_5 = arith.constant 0 : i32
    %c0_i32_6 = arith.constant 0 : i32
    %c0_i32_7 = arith.constant 0 : i32
    %1 = tpu.memref_slice %arg1[%c0_i32_4, %c0_i32_5, %c0_i32_6, %c0_i32_7] : memref<2x4x16x16xf32, #tpu.memory_space<hbm>> -> memref<2x4x16x16xf32, #tpu.memory_space<hbm>>
    %2 = tpu.memref_slice %arg2[%c0_i32] : memref<1x!tpu.dma_semaphore, #tpu.memory_space<semaphore_mem>> -> memref<1x!tpu.dma_semaphore, #tpu.memory_space<semaphore_mem>>
    %3 = tpu.memref_squeeze %2 : memref<1x!tpu.dma_semaphore, #tpu.memory_space<semaphore_mem>> -> memref<!tpu.dma_semaphore, #tpu.memory_space<semaphore_mem>>
    tpu.enqueue_dma source(%0 : memref<2x4x16x16xf32, #tpu.memory_space<any>>) target(%1 : memref<2x4x16x16xf32, #tpu.memory_space<hbm>>) target_semaphore(%3 : memref<!tpu.dma_semaphore, #tpu.memory_space<semaphore_mem>>)
    %c0_i32_8 = arith.constant 0 : i32
    %c0_i32_9 = arith.constant 0 : i32
    %c0_i32_10 = arith.constant 0 : i32
    %c0_i32_11 = arith.constant 0 : i32
    %c0_i32_12 = arith.constant 0 : i32
    %4 = tpu.memref_slice %arg0[%c0_i32_9, %c0_i32_10, %c0_i32_11, %c0_i32_12] : memref<2x4x16x16xf32, #tpu.memory_space<any>> -> memref<2x4x16x16xf32, #tpu.memory_space<any>>
    %c0_i32_13 = arith.constant 0 : i32
    %c0_i32_14 = arith.constant 0 : i32
    %c0_i32_15 = arith.constant 0 : i32
    %c0_i32_16 = arith.constant 0 : i32
    %5 = tpu.memref_slice %arg1[%c0_i32_13, %c0_i32_14, %c0_i32_15, %c0_i32_16] : memref<2x4x16x16xf32, #tpu.memory_space<hbm>> -> memref<2x4x16x16xf32, #tpu.memory_space<hbm>>
    %6 = tpu.memref_slice %arg2[%c0_i32_8] : memref<1x!tpu.dma_semaphore, #tpu.memory_space<semaphore_mem>> -> memref<1x!tpu.dma_semaphore, #tpu.memory_space<semaphore_mem>>
    %7 = tpu.memref_squeeze %6 : memref<1x!tpu.dma_semaphore, #tpu.memory_space<semaphore_mem>> -> memref<!tpu.dma_semaphore, #tpu.memory_space<semaphore_mem>>
    tpu.wait_dma2 semaphore(%7 : memref<!tpu.dma_semaphore, #tpu.memory_space<semaphore_mem>>) src(%4 : memref<2x4x16x16xf32, #tpu.memory_space<any>>) dst(%5 : memref<2x4x16x16xf32, #tpu.memory_space<hbm>>)
    return
  }
}

</mosaic_0001>

<bundles_post_ra>
// kernel: tpu_custom_call.1
= control target key start
LH: loop header
LB: loop body
LE: loop exit
PB: predicated region body
PF: predicated region fallthrough
CT: control target
= control target key end

     0   :  { %s30_s6 = smov [#allocation2]   ;;  %s31_s7 = smov 131072   ;;  %s49_s0 = inlined_call_operand.hbm [shape: f32[2,4,16,16], index: 0, kind: input, shape index: {}]   ;;  %s50_s1 = inlined_call_operand.hbm [shape: f32[2,4,16,16], index: 1, kind: output, shape index: {}]  }
   0x1   :  { %s32_s8 = smov 0  }
   0x2   :  { %12 = dma.general %s49_s0, 2048, %s50_s1, %s30_s6, %s31_s7, [#allocation4], %s32_s8, 0  }
   0x3   :  { %28 = dma.done.wait [#allocation2], 2048 }
   0x4   :  { %29 = vsyncadd [#allocation2], 4294965248 }
   0x5   :  { %18 = vsyncmov [#allocation2] }
   0x8   :  { %s19_s13 = vpop.sfrf %18 }
   0x9   :  { %p24_p0 = scmp.ne.s32.totalorder %s19_s13, 0 }
   0xb   :  { %23 = shalt.err (%p24_p0)  }

</bundles_post_ra>
